<compile_context>
chip_gen: v5e
topology: v5e:2x2
jax: 0.10.0
libtpu: 0.0.40
codegen_flags: <defaults>
</compile_context>

<pallas_src>
import jax
import jax.numpy as jnp
from jax import lax
from jax.experimental import pallas as pl
from jax.experimental.pallas import tpu as pltpu


def _round_up(x, m):
    return (x + m - 1) // m * m


def _pick_tile(n, align, cap):
    """Largest multiple of `align` that divides n and is <= cap; else n itself."""
    if n % align != 0:
        return n
    t = min(n, cap)
    t -= t % align
    while t > 0 and n % t != 0:
        t -= align
    return t if t > 0 else n


def _proj_kernel(z_ref, wt_ref, b_ref, zp_ref):
    # z_ref : (1, TM, F)  input tile
    # wt_ref: (F, F)      pre-transposed Conv1d weight (W^T), bf16
    # b_ref : (1, F)      Conv1d bias, f32
    # zp_ref: (1, TM, F)  projected tile, bf16
    zt = z_ref[0].astype(jnp.bfloat16)
    acc = jnp.dot(zt, wt_ref[...], preferred_element_type=jnp.float32) + b_ref[...]
    zp_ref[0] = acc.astype(zp_ref.dtype)


def _adj_kernel(zpq_ref, zpk_ref, adj_ref):
    # zpq_ref: (1, TQ, F) bf16   zpk_ref: (1, TK, F) bf16   adj_ref: (1, TQ, TK)
    s = lax.dot_general(
        zpq_ref[0],
        zpk_ref[0],
        dimension_numbers=(((1,), (1,)), ((), ())),   # contract feature dims: A @ B^T
        preferred_element_type=jnp.float32,
    )
    # sigmoid(x) == 0.5*(tanh(x/2) + 1): a single EUP transcendental per element.
    adj_ref[0] = (0.5 * (jnp.tanh(0.5 * s) + 1.0)).astype(adj_ref.dtype)


def inner_product_decoder(z, w=None, b=None, *, out_dtype=jnp.bfloat16,
                          tq_cap=512, tk_cap=1024):
    """z: [B, N, F]; w: [F, F] Conv1d(k=1) weight [out,in] or None (identity proj);
    b: [F] bias.  Returns adj [B, N, N] (default bf16 to halve HBM writeback)."""
    B, N, F = z.shape

    # TODO(synk): nn.Dropout is identity in eval mode; training-mode dropout
    # (pltpu.prng_seed / prng_random_bits masking) is not implemented.

    # Pad N to a lane-aligned multiple of 128 so every tile is (8,128)-aligned and
    # output stores are unmasked; padded rows/cols are sliced off at the end.
    Np = _round_up(N, 128)
    if Np != N:
        z = jnp.pad(z, ((0, 0), (0, Np - N), (0, 0)))

    # ---- per-node projection (Conv1d k=1), computed once per element ----
    if w is not None:
        wt = jnp.transpose(w).astype(jnp.bfloat16)        # [in_ch, out_ch], hoisted
        b2d = b.reshape(1, F).astype(jnp.float32)
        tm = _pick_tile(Np, 8, 512)
        zp = pl.pallas_call(
            _proj_kernel,
            out_shape=jax.ShapeDtypeStruct((B, Np, F), jnp.bfloat16),
            grid_spec=pltpu.PrefetchScalarGridSpec(
                num_scalar_prefetch=0,
                grid=(B, Np // tm),
                in_specs=[
                    pl.BlockSpec((1, tm, F), lambda bi, mi: (bi, mi, 0)),
                    pl.BlockSpec((F, F), lambda bi, mi: (0, 0)),
                    pl.BlockSpec((1, F), lambda bi, mi: (0, 0)),
                ],
                out_specs=pl.BlockSpec((1, tm, F), lambda bi, mi: (bi, mi, 0)),
            ),
            compiler_params=pltpu.CompilerParams(
                dimension_semantics=("parallel", "parallel")),
        )(z, wt, b2d)
    else:
        zp = z.astype(jnp.bfloat16)                       # with_proj=False (Identity)

    # ---- adjacency: sigmoid(zp @ zp^T), lane-dense (TQ, TK) output tiles ----
    tq = _pick_tile(Np, 8, tq_cap)
    # Keep >= 2 independent (batch, q-tile) blocks so v7x's two TensorCores both work.
    if B * (Np // tq) < 2 and Np >= 16:
        tq = _pick_tile(Np, 8, max(8, tq // 2))
    tk = _pick_tile(Np, 128, tk_cap)

    adj = pl.pallas_call(
        _adj_kernel,
        out_shape=jax.ShapeDtypeStruct((B, Np, Np), out_dtype),
        grid_spec=pltpu.PrefetchScalarGridSpec(
            num_scalar_prefetch=0,
            grid=(B, Np // tq, Np // tk),
            in_specs=[
                pl.BlockSpec((1, tq, F), lambda bi, qi, ki: (bi, qi, 0)),  # q-tile
                pl.BlockSpec((1, tk, F), lambda bi, qi, ki: (bi, ki, 0)),  # k-tile
            ],
            out_specs=pl.BlockSpec((1, tq, tk), lambda bi, qi, ki: (bi, qi, ki)),
        ),
        compiler_params=pltpu.CompilerParams(
            dimension_semantics=("parallel", "parallel", "parallel")),
    )(zp, zp)

    if Np != N:
        adj = adj[:, :N, :N]
    return adj


if __name__ == "__main__":
    # Small shapes consistent with the module: z [B, N, F].
    B, N, F = 2, 8, 32

    key = jax.random.PRNGKey(0)
    kz, kw, kb = jax.random.split(key, 3)

    z = jax.random.normal(kz, (B, N, F), dtype=jnp.float32)
    # Deterministic synthetic Conv1d(F, F, kernel_size=1) parameters.
    w = jax.random.normal(kw, (F, F), dtype=jnp.float32) * (1.0 / jnp.sqrt(F))
    bias = jax.random.normal(kb, (F,), dtype=jnp.float32) * 0.1

    # with_proj=True path.
    adj = jax.block_until_ready(inner_product_decoder(z, w, bias))
    assert adj.shape == (B, N, N)
    assert adj.dtype == jnp.bfloat16

    zp_ref = jnp.einsum("bnf,gf->bng", z, w) + bias
    adj_ref = jax.nn.sigmoid(jnp.einsum("bnf,bmf->bnm", zp_ref, zp_ref))
    # bf16 MXU operands + bf16 output -> looser tolerance than the f32 reference.
    assert jnp.allclose(adj.astype(jnp.float32), adj_ref, atol=3e-2), (
        float(jnp.max(jnp.abs(adj.astype(jnp.float32) - adj_ref))))

    # with_proj=False (Identity projection) path.
    adj_id = jax.block_until_ready(inner_product_decoder(z))
    adj_id_ref = jax.nn.sigmoid(jnp.einsum("bnf,bmf->bnm", z, z))
    assert jnp.allclose(adj_id.astype(jnp.float32), adj_id_ref, atol=3e-2)

    print("KERNEL_OK")
</pallas_src>

<mosaic_0001>
module attributes {stable_mosaic.version = 11 : i64} {
  func.func @_proj_kernel(%arg0: i32, %arg1: i32, %arg2: memref<1x128x32xf32, #tpu.memory_space<vmem>>, %arg3: memref<32x32xbf16, #tpu.memory_space<vmem>>, %arg4: memref<1x32xf32, #tpu.memory_space<vmem>>, %arg5: memref<1x128x32xbf16, #tpu.memory_space<vmem>>) attributes {dimension_semantics = [#tpu.dimension_semantics<parallel>, #tpu.dimension_semantics<parallel>], iteration_bounds = array<i64: 2, 1>, scalar_prefetch = 0 : i64, scratch_operands = 0 : i64, tpu.core_type = #tpu.core_type<tc>, window_params = [{transform_indices = @transform_0, window_bounds = array<i64: 1, 128, 32>}, {pipeline_mode = #tpu.pipeline_mode<synchronous>, transform_indices = @transform_1, window_bounds = array<i64: 32, 32>}, {pipeline_mode = #tpu.pipeline_mode<synchronous>, transform_indices = @transform_2, window_bounds = array<i64: 1, 32>}, {transform_indices = @transform_3, window_bounds = array<i64: 1, 128, 32>}]} {
    %c0 = arith.constant 0 : index
    %c0_0 = arith.constant 0 : index
    %c0_1 = arith.constant 0 : index
    %0 = vector.load %arg2[%c0, %c0_0, %c0_1] : memref<1x128x32xf32, #tpu.memory_space<vmem>>, vector<1x128x32xf32>
    %1 = vector.shape_cast %0 : vector<1x128x32xf32> to vector<128x32xf32>
    %2 = arith.truncf %1 : vector<128x32xf32> to vector<128x32xbf16>
    %c0_2 = arith.constant 0 : index
    %c0_3 = arith.constant 0 : index
    %3 = vector.load %arg3[%c0_2, %c0_3] : memref<32x32xbf16, #tpu.memory_space<vmem>>, vector<32x32xbf16>
    %cst = arith.constant dense<0.000000e+00> : vector<128x32xf32>
    %4 = tpu.matmul %2, %3, %cst {dimension_numbers = #tpu.dot_dimension_numbers<[1], [0], [0], [1], [0, 0, 1, 1], [], []>} : vector<128x32xbf16>, vector<32x32xbf16>, vector<128x32xf32> -> vector<128x32xf32>
    %c0_4 = arith.constant 0 : index
    %c0_5 = arith.constant 0 : index
    %5 = vector.load %arg4[%c0_4, %c0_5] : memref<1x32xf32, #tpu.memory_space<vmem>>, vector<1x32xf32>
    %6 = vector.broadcast %5 : vector<1x32xf32> to vector<128x32xf32>
    %7 = arith.addf %4, %6 : vector<128x32xf32>
    %8 = arith.truncf %7 : vector<128x32xf32> to vector<128x32xbf16>
    %c0_6 = arith.constant 0 : index
    %c0_7 = arith.constant 0 : index
    %c0_8 = arith.constant 0 : index
    %9 = vector.load %arg5[%c0_6, %c0_7, %c0_8] : memref<1x128x32xbf16, #tpu.memory_space<vmem>>, vector<1x128x32xbf16>
    %10 = vector.shape_cast %9 : vector<1x128x32xbf16> to vector<128x32xbf16>
    %11 = vector.shape_cast %8 : vector<128x32xbf16> to vector<1x128x32xbf16>
    tpu.vector_store %arg5[%c0_6, %c0_7, %c0_8], %11 {strides = array<i32>} : memref<1x128x32xbf16, #tpu.memory_space<vmem>>, vector<1x128x32xbf16>,
    return
  }
  func.func @transform_0(%arg0: i32, %arg1: i32) -> (i32, i32, i32) {
    %c0_i32 = arith.constant 0 : i32
    %c0_i32_0 = arith.constant 0 : i32
    return %arg0, %arg1, %c0_i32 : i32, i32, i32
  }
  func.func @transform_1(%arg0: i32, %arg1: i32) -> (i32, i32) {
    %c0_i32 = arith.constant 0 : i32
    %c0_i32_0 = arith.constant 0 : i32
    %c0_i32_1 = arith.constant 0 : i32
    return %c0_i32, %c0_i32_0 : i32, i32
  }
  func.func @transform_2(%arg0: i32, %arg1: i32) -> (i32, i32) {
    %c0_i32 = arith.constant 0 : i32
    %c0_i32_0 = arith.constant 0 : i32
    %c0_i32_1 = arith.constant 0 : i32
    return %c0_i32, %c0_i32_0 : i32, i32
  }
  func.func @transform_3(%arg0: i32, %arg1: i32) -> (i32, i32, i32) {
    %c0_i32 = arith.constant 0 : i32
    %c0_i32_0 = arith.constant 0 : i32
    return %arg0, %arg1, %c0_i32 : i32, i32, i32
  }
}

</mosaic_0001>

<bundles_post_ra>
// kernel: tpu_custom_call.1
= control target key start
LH: loop header
LB: loop body
LE: loop exit
PB: predicated region body
PF: predicated region fallthrough
CT: control target
= control target key end

     0   :  { %s555_s12 = smov 0   ;;  %s557_s13 = smov 0   ;;  %s661_s0 = inlined_call_operand.vmem [shape: f32[2,128,32], index: 0, kind: input, shape index: {}]   ;;  %s662_s1 = inlined_call_operand.vmem [shape: bf16[32,32], index: 1, kind: input, shape index: {}]   ;;  %s663_s2 = inlined_call_operand.vmem [shape: f32[1,32], index: 2, kind: input, shape index: {}]   ;;  %s664_s3 = inlined_call_operand.vmem [shape: bf16[2,128,32], index: 3, kind: output, shape index: {}]  }
   0x1   :  { %s559_s14 = smov 0  }
   0x2 LB: > { %s25_s15 = sadd.s32 1, %s529_s13  ;;  %p453_p0 = scmp.ge.s32.totalorder %s533_s14, 1  ;;  %s533_s14 = sphi %s559_s14, %s13_s14   ;;  %s529_s13 = sphi %s557_s13, %s666_s13   ;;  %s525_s12 = sphi %s555_s12, %s665_s12  }
   0x3   : > { %p27_p1 = scmp.ge.s32.totalorder %s25_s15, 2  ;;  %p158_p2 = scmp.lt.s32.totalorder %s533_s14, 3 }
   0x5   : > { %s668_s15 = smov (%p27_p1, %s25_s15), 0  ;;  %p159_p3 = pnand %p453_p0, %p158_p2 }
   0x6   : > { %p191_p4 = scmp.lt.s32.totalorder (!%p159_p3), %s525_s12, 1 }
   0x7   : > { %162 = sbr.rel (%p159_p3) target bundleno = 183 (0xb7), region = 32 }
   0xc   : > { %v479_v0 = vld [vmem:[%s662_s1 + $0x8] sm:$0xff]  ;;  %v478_v1 = vld [vmem:[%s662_s1] sm:$0xff]  ;;  %s670_s12 = smov (!%p191_p4, %s525_s12), 1  ;;  %vm255_vm0 = vcmask 261120   ;;  %vm345_vm1 = vcmask 257024  }
   0xd   : > { %286 = vmatpush.bf16.msra.mxu0 %v479_v0  ;;  %480 = vmatpush.bf16.msra.mxu1 %v479_v0  ;;  %s476_s20 = sshll.u32 %s670_s12, 7  ;;  %v596_v26 = vld [vmem:[%s663_s2] ss:$0 sm:$0xff]  ;;  %s477_s26 = sshll.u32 %s670_s12, 6 }
   0xe   : > { %481 = vmatpush.bf16.msra.mxu2 %v479_v0  ;;  %482 = vmatpush.bf16.msra.mxu3 %v479_v0  ;;  %s198_s23 = scalar_lea.vmem %s661_s0, %s476_s20  ;;  %s603_s29 = scalar_lea.vmem %s664_s3, %s477_s26 }
   0xf   : > { %v211_v2 = vld [vmem:[%s198_s23] sm:$0xff]  ;;  %v212_v3 = vld [vmem:[%s198_s23 + $0x8] sm:$0xff]  ;;  %v213_v14 = vld [vmem:[%s198_s23 + $0x10] sm:$0xff] }
  0x10   : > { %v215_v4 = vld [vmem:[%s198_s23 + $0x20] sm:$0xff]  ;;  %v227_v5 = vpack.c.bf16 %v212_v3, %v211_v2  ;;  %v216_v6 = vld [vmem:[%s198_s23 + $0x28] sm:$0xff]  ;;  %v214_v15 = vld [vmem:[%s198_s23 + $0x18] sm:$0xff] }
  0x11   : > { %287 = vmatpush.bf16.msra.mxu0 %v478_v1  ;;  %483 = vmatpush.bf16.msra.mxu1 %v478_v1  ;;  %v219_v7 = vld [vmem:[%s198_s23 + $0x40] sm:$0xff]  ;;  %v220_v8 = vld [vmem:[%s198_s23 + $0x48] sm:$0xff]  ;;  %v229_v9 = vpack.c.bf16 %v216_v6, %v215_v4  ;;  %v217_v16 = vld [vmem:[%s198_s23 + $0x30] sm:$0xff]  ;;  %v228_v22 = vpack.c.bf16 %v214_v15, %v213_v14 }
  0x12   : > { %484 = vmatpush.bf16.msra.mxu2 %v478_v1  ;;  %485 = vmatpush.bf16.msra.mxu3 %v478_v1  ;;  %v231_v10 = vpack.c.bf16 %v220_v8, %v219_v7  ;;  %v223_v11 = vld [vmem:[%s198_s23 + $0x60] sm:$0xff]  ;;  %v224_v12 = vld [vmem:[%s198_s23 + $0x68] sm:$0xff]  ;;  %v218_v17 = vld [vmem:[%s198_s23 + $0x38] sm:$0xff] }
  0x13   : > { %v233_v13 = vpack.c.bf16 %v224_v12, %v223_v11  ;;  %v221_v18 = vld [vmem:[%s198_s23 + $0x50] sm:$0xff]  ;;  %v222_v19 = vld [vmem:[%s198_s23 + $0x58] sm:$0xff]  ;;  %v230_v23 = vpack.c.bf16 %v218_v17, %v217_v16 }
  0x14   : > { %466 = vmatmul.msk.bf16.vlgmr.msra.gmra.mxu0 %vm255_vm0, %v227_v5  ;;  %468 = vmatmul.msk.bf16.vlgmr.msra.gmra.mxu1 %vm255_vm0, %v229_v9  ;;  %v225_v20 = vld [vmem:[%s198_s23 + $0x70] sm:$0xff]  ;;  %v226_v21 = vld [vmem:[%s198_s23 + $0x78] sm:$0xff]  ;;  %v232_v24 = vpack.c.bf16 %v222_v19, %v221_v18 }
  0x15   : > { %470 = vmatmul.msk.bf16.vlgmr.msra.gmra.mxu2 %vm255_vm0, %v231_v10  ;;  %472 = vmatmul.msk.bf16.vlgmr.msra.gmra.mxu3 %vm255_vm0, %v233_v13  ;;  %v234_v25 = vpack.c.bf16 %v226_v21, %v225_v20 }
  0x24   : > { %467 = vmatmul.msk.bf16.gmra.mxu0 %vm255_vm0, %v228_v22  ;;  %469 = vmatmul.msk.bf16.gmra.mxu1 %vm255_vm0, %v230_v23 }
  0x25   : > { %471 = vmatmul.msk.bf16.gmra.mxu2 %vm255_vm0, %v232_v24  ;;  %473 = vmatmul.msk.bf16.gmra.mxu3 %vm255_vm0, %v234_v25 }
  0x91   : > { %v289_v27 = vpop.f32.mrf.mxu0  ;;  %v299_v29 = vpop.f32.mrf.mxu1 }
  0x92   : > { %v290_v28 = vadd.f32 %v596_v26, %v289_v27  ;;  %v300_v30 = vadd.f32 %v596_v26, %v299_v29 }
  0x94   : > { %v329_v31 = vpack.c.bf16 %v290_v28, %v290_v28  ;;  %v333_v32 = vpack.c.bf16 %v300_v30, %v300_v30 }
  0x96   : > { %346 = vst.msk [vmem:[%s603_s29] sm:$0xf] %vm345_vm1, %v329_v31 }
  0x97   : > { %350 = vst.msk [vmem:[%s603_s29 + $0x10] sm:$0xf] %vm345_vm1, %v333_v32 }
  0x98   : > { %v309_v33 = vpop.f32.mrf.mxu2  ;;  %v319_v35 = vpop.f32.mrf.mxu3 }
  0x99   : > { %v310_v34 = vadd.f32 %v596_v26, %v309_v33  ;;  %v291_v36 = vpop.f32.mrf.mxu0  ;;  %v320_v37 = vadd.f32 %v596_v26, %v319_v35  ;;  %v301_v39 = vpop.f32.mrf.mxu1 }
  0x9a   : > { %v292_v38 = vadd.f32 %v596_v26, %v291_v36  ;;  %v302_v41 = vadd.f32 %v596_v26, %v301_v39 }
  0x9b   : > { %v337_v40 = vpack.c.bf16 %v310_v34, %v310_v34  ;;  %v341_v42 = vpack.c.bf16 %v320_v37, %v320_v37 }
  0x9c   : > { %v330_v43 = vpack.c.bf16 %v292_v38, %v292_v38  ;;  %v334_v44 = vpack.c.bf16 %v302_v41, %v302_v41 }
  0x9d   : > { %354 = vst.msk [vmem:[%s603_s29 + $0x20] sm:$0xf] %vm345_vm1, %v337_v40 }
  0x9e   : > { %358 = vst.msk [vmem:[%s603_s29 + $0x30] sm:$0xf] %vm345_vm1, %v341_v42 }
  0x9f   : > { %347 = vst.msk [vmem:[%s603_s29 + $0x4] sm:$0xf] %vm345_vm1, %v330_v43 }
  0xa0   : > { %351 = vst.msk [vmem:[%s603_s29 + $0x14] sm:$0xf] %vm345_vm1, %v334_v44  ;;  %v311_v45 = vpop.f32.mrf.mxu2  ;;  %v321_v47 = vpop.f32.mrf.mxu3 }
  0xa1   : > { %v312_v46 = vadd.f32 %v596_v26, %v311_v45  ;;  %v294_v48 = vpop.f32.mrf.mxu0  ;;  %v322_v49 = vadd.f32 %v596_v26, %v321_v47  ;;  %v304_v51 = vpop.f32.mrf.mxu1 }
  0xa2   : > { %v295_v50 = vadd.f32 %v596_v26, %v294_v48  ;;  %v305_v53 = vadd.f32 %v596_v26, %v304_v51 }
  0xa3   : > { %v338_v52 = vpack.c.bf16 %v312_v46, %v312_v46  ;;  %v342_v54 = vpack.c.bf16 %v322_v49, %v322_v49 }
  0xa4   : > { %v331_v55 = vpack.c.bf16 %v295_v50, %v295_v50  ;;  %v335_v56 = vpack.c.bf16 %v305_v53, %v305_v53 }
  0xa5   : > { %355 = vst.msk [vmem:[%s603_s29 + $0x24] sm:$0xf] %vm345_vm1, %v338_v52 }
  0xa6   : > { %359 = vst.msk [vmem:[%s603_s29 + $0x34] sm:$0xf] %vm345_vm1, %v342_v54 }
  0xa7   : > { %348 = vst.msk [vmem:[%s603_s29 + $0x8] sm:$0xf] %vm345_vm1, %v331_v55 }
  0xa8   : > { %352 = vst.msk [vmem:[%s603_s29 + $0x18] sm:$0xf] %vm345_vm1, %v335_v56  ;;  %v314_v57 = vpop.f32.mrf.mxu2  ;;  %v324_v59 = vpop.f32.mrf.mxu3 }
  0xa9   : > { %v315_v58 = vadd.f32 %v596_v26, %v314_v57  ;;  %v296_v60 = vpop.f32.mrf.mxu0  ;;  %v325_v61 = vadd.f32 %v596_v26, %v324_v59  ;;  %v306_v63 = vpop.f32.mrf.mxu1 }
  0xaa   : > { %v297_v62 = vadd.f32 %v596_v26, %v296_v60  ;;  %v307_v1 = vadd.f32 %v596_v26, %v306_v63 }
  0xab   : > { %v339_v0 = vpack.c.bf16 %v315_v58, %v315_v58  ;;  %v343_v2 = vpack.c.bf16 %v325_v61, %v325_v61 }
  0xac   : > { %v332_v3 = vpack.c.bf16 %v297_v62, %v297_v62  ;;  %v336_v4 = vpack.c.bf16 %v307_v1, %v307_v1 }
  0xad   : > { %356 = vst.msk [vmem:[%s603_s29 + $0x28] sm:$0xf] %vm345_vm1, %v339_v0 }
  0xae   : > { %360 = vst.msk [vmem:[%s603_s29 + $0x38] sm:$0xf] %vm345_vm1, %v343_v2 }
  0xaf   : > { %349 = vst.msk [vmem:[%s603_s29 + $0xc] sm:$0xf] %vm345_vm1, %v332_v3 }
  0xb0   : > { %353 = vst.msk [vmem:[%s603_s29 + $0x1c] sm:$0xf] %vm345_vm1, %v336_v4  ;;  %v316_v5 = vpop.f32.mrf.mxu2  ;;  %v326_v7 = vpop.f32.mrf.mxu3 }
  0xb1   : > { %v317_v6 = vadd.f32 %v596_v26, %v316_v5  ;;  %v327_v8 = vadd.f32 %v596_v26, %v326_v7 }
  0xb3   : > { %v340_v9 = vpack.c.bf16 %v317_v6, %v317_v6  ;;  %v344_v10 = vpack.c.bf16 %v327_v8, %v327_v8 }
  0xb5   : > { %357 = vst.msk [vmem:[%s603_s29 + $0x2c] sm:$0xf] %vm345_vm1, %v340_v9 }
  0xb6   : > { %361 = vst.msk [vmem:[%s603_s29 + $0x3c] sm:$0xf] %vm345_vm1, %v344_v10 }
  0xb7 PF: > { %s13_s14 = sadd.s32 1, %s533_s14   ;;  %s665_s12 = smov %s529_s13 }
  0xb8   : > { %p10_p5 = scmp.ge.s32.totalorder %s13_s14, 4   ;;  %s666_s13 = smov %s668_s15 }
  0xba   :  { %12 = sbr.rel (!%p10_p5) target bundleno = 2 (0x2), region = 62 }

</bundles_post_ra>
